<compile_context>
chip_gen: v7x
topology: tpu7x:2x2x1
jax: 0.10.0
libtpu: 0.0.40
codegen_flags: <defaults>
</compile_context>

<pallas_src>
import math

import jax
import jax.numpy as jnp
from jax.experimental import pallas as pl
from jax.experimental.pallas import tpu as pltpu

LN_EPS = 1e-5  # torch.nn.LayerNorm default eps


def _round_up(a: int, b: int) -> int:
    return ((a + b - 1) // b) * b


def category_value_encoder_kernel(idx_ref, emb_ref, gamma_ref, beta_ref, o_ref):
    """One row-tile: embedding lookup (one-hot MXU matmul) + LayerNorm.

    idx_ref   : (rows_p, pack)        int32  VMEM  token -> category index
    emb_ref   : (vocab_p, D)          f32    VMEM  padded embedding table
    gamma_ref : (1, D)                f32    VMEM  LayerNorm weight
    beta_ref  : (1, D)                f32    VMEM  LayerNorm bias
    o_ref     : (rows_p, pack * D)    f32/bf16 VMEM  lane-dense packed output

    `pack` tokens are packed along the lane axis of each output row so the
    output block's last dim is a multiple of 128 even when D < 128.
    """
    idx = idx_ref[...]                       # (rows_p, pack) int32
    emb = emb_ref[...]                       # (vocab_p, D)
    gamma = gamma_ref[...]                   # (1, D)
    beta = beta_ref[...]                     # (1, D)

    rows_p, pack = idx_ref.shape
    vocab_p, d = emb_ref.shape

    lane_iota = jax.lax.broadcasted_iota(jnp.int32, (rows_p, vocab_p), 1)

    # `pack` is a trace-time constant; this loop unrolls.
    for p in range(pack):
        # Gather via one-hot matmul on the MXU (table is VMEM-resident; no
        # data-dependent gather lowering needed).  Exact in f32: 0/1 weights.
        onehot = (lane_iota == idx[:, p:p + 1]).astype(emb.dtype)   # (rows_p, vocab_p)
        x = jnp.dot(onehot, emb, preferred_element_type=jnp.float32)  # (rows_p, D)

        # LayerNorm over the feature (lane) dimension, f32 throughout.
        mean = jnp.mean(x, axis=-1, keepdims=True)
        xc = x - mean
        var = jnp.mean(xc * xc, axis=-1, keepdims=True)
        y = xc * jax.lax.rsqrt(var + LN_EPS) * gamma + beta

        # Static lane slice of the (lane-dense) output block.
        o_ref[:, p * d:(p + 1) * d] = y.astype(o_ref.dtype)


def category_value_encoder_forward(x_idx, params, *, tile_rows=1024, out_dtype=None):
    """x_idx: (batch, seq_len) integer categories -> (batch, seq_len, D)."""
    batch, seq_len = x_idx.shape
    emb = params["embedding"]          # (V, D)
    gamma = params["gamma"]            # (1, D)
    beta = params["beta"]              # (1, D)
    vocab, d_model = emb.shape
    out_dtype = emb.dtype if out_dtype is None else out_dtype
    out_itemsize = jnp.dtype(out_dtype).itemsize

    # ---- lane-dense packing factor for the output -------------------------
    if d_model % 128 == 0:
        pack = 1
    else:
        # smallest pack with pack*d_model a multiple of 128 (e.g. D=32 -> 4)
        pack = 128 // math.gcd(d_model, 128)
    packed_d = pack * d_model

    # ---- pad vocab to a multiple of 128 (clean MXU K / (8,128) tiling) ----
    vocab_p = _round_up(max(vocab, 128), 128)
    emb_p = emb if vocab_p == vocab else jnp.pad(emb, ((0, vocab_p - vocab), (0, 0)))

    # ---- row tiling --------------------------------------------------------
    n_rows = batch * seq_len
    row_align = 8 * pack                       # packed rows per tile must be %8

    tr = _round_up(min(max(tile_rows, row_align), max(n_rows, 1)), row_align)

    # VMEM cap: double-buffered out+idx tiles plus the resident table must
    # stay well inside the smallest physical VMEM (v7x: 64 MiB).
    def _tile_vmem_bytes(t):
        rows_packed = t // pack
        out_b = rows_packed * packed_d * out_itemsize
        idx_b = rows_packed * pack * 4
        const_b = vocab_p * d_model * 4 + 2 * d_model * 4
        return 2 * (out_b + idx_b + const_b)

    vmem_budget = 24 << 20
    while tr > row_align and _tile_vmem_bytes(tr) > vmem_budget:
        tr -= row_align

    # Keep >= 2 grid steps when the row count allows (v7x has 2 TensorCores
    # and shards the "parallel" grid axis across them).
    if n_rows > 2 * row_align:
        tr = min(tr, _round_up((n_rows + 1) // 2, row_align))

    n_rows_padded = _round_up(n_rows, tr)
    rows_p = tr // pack
    grid = (n_rows_padded // tr,)

    # ---- index preparation --------------------------------------------------
    # Clamp so out-of-range categories cannot silently become a zero one-hot
    # row (nn.Embedding would raise instead).
    idx_flat = jnp.clip(x_idx.astype(jnp.int32).reshape(-1), 0, vocab - 1)
    if n_rows_padded != n_rows:
        # Padded rows gather category 0; they are sliced off below, never read.
        idx_flat = jnp.pad(idx_flat, (0, n_rows_padded - n_rows))
    idx2d = idx_flat.reshape(n_rows_padded // pack, pack)

    vmem_limit_bytes = min(max(_tile_vmem_bytes(tr) + (8 << 20), 32 << 20), 48 << 20)

    cost = pl.CostEstimate(
        flops=2 * n_rows_padded * vocab_p * d_model,
        transcendentals=n_rows_padded,  # one rsqrt per token
        bytes_accessed=(n_rows_padded * 4                       # indices in
                        + n_rows_padded * d_model * out_itemsize  # output
                        + vocab_p * d_model * 4                  # table
                        + 2 * d_model * 4),                      # gamma/beta
    )

    out = pl.pallas_call(
        category_value_encoder_kernel,
        out_shape=jax.ShapeDtypeStruct((n_rows_padded // pack, packed_d), out_dtype),
        grid_spec=pltpu.PrefetchScalarGridSpec(
            num_scalar_prefetch=0,
            grid=grid,
            in_specs=[
                pl.BlockSpec((rows_p, pack), lambda i: (i, 0)),        # indices
                pl.BlockSpec((vocab_p, d_model), lambda i: (0, 0)),    # table
                pl.BlockSpec((1, d_model), lambda i: (0, 0)),          # gamma
                pl.BlockSpec((1, d_model), lambda i: (0, 0)),          # beta
            ],
            out_specs=pl.BlockSpec((rows_p, packed_d), lambda i: (i, 0)),
        ),
        compiler_params=pltpu.CompilerParams(
            dimension_semantics=("parallel",),
            vmem_limit_bytes=vmem_limit_bytes,
        ),
        cost_estimate=cost,
    )(idx2d, emb_p, gamma, beta)

    # Unpacking the lane-packed rows is a free reshape (row-major layout).
    out = out.reshape(n_rows_padded, d_model)[:n_rows]
    return out.reshape(batch, seq_len, d_model)


def init_params(key, num_embeddings, embedding_dim, padding_idx=None,
                dtype=jnp.float32):
    """Deterministic synthetic parameters matching nn.Embedding / nn.LayerNorm."""
    k_emb, k_g, k_b = jax.random.split(key, 3)
    emb = jax.random.normal(k_emb, (num_embeddings, embedding_dim), dtype)
    if padding_idx is not None:
        emb = emb.at[padding_idx].set(0.0)   # nn.Embedding zeroes the pad row
    gamma = 1.0 + 0.1 * jax.random.normal(k_g, (1, embedding_dim), dtype)
    beta = 0.1 * jax.random.normal(k_b, (1, embedding_dim), dtype)
    return dict(embedding=emb, gamma=gamma, beta=beta)


def reference_forward(x_idx, params):
    """Pure-JAX reference (mirrors the PyTorch module exactly)."""
    emb = params["embedding"][x_idx.astype(jnp.int32)]          # (B, S, D)
    mean = emb.mean(-1, keepdims=True)
    var = ((emb - mean) ** 2).mean(-1, keepdims=True)
    y = (emb - mean) / jnp.sqrt(var + LN_EPS)
    return y * params["gamma"][0] + params["beta"][0]


if __name__ == "__main__":
    # Small shapes consistent with the module: batch=2, seq_len=8,
    # num_embeddings (n_input_bins)=51, embedding_dim=32, padding_idx=0.
    batch, seq_len = 2, 8
    num_embeddings, embedding_dim = 51, 32
    padding_idx = 0

    key = jax.random.PRNGKey(0)
    kx, kp = jax.random.split(key)
    x_idx = jax.random.randint(kx, (batch, seq_len), 0, num_embeddings,
                               dtype=jnp.int32)
    params = init_params(kp, num_embeddings, embedding_dim, padding_idx)

    out = category_value_encoder_forward(x_idx, params)
    out = jax.block_until_ready(out)

    ref = reference_forward(x_idx, params)
    assert out.shape == (batch, seq_len, embedding_dim)
    assert jnp.allclose(out, ref, atol=1e-5, rtol=1e-5), "mismatch vs reference"

    print("KERNEL_OK")
</pallas_src>

<mosaic_0001>
module attributes {stable_mosaic.version = 11 : i64} {
  func.func @category_value_encoder_kernel(%arg0: i32, %arg1: memref<8x4xi32, #tpu.memory_space<vmem>>, %arg2: memref<128x32xf32, #tpu.memory_space<vmem>>, %arg3: memref<1x32xf32, #tpu.memory_space<vmem>>, %arg4: memref<1x32xf32, #tpu.memory_space<vmem>>, %arg5: memref<8x128xf32, #tpu.memory_space<vmem>>) attributes {dimension_semantics = [#tpu.dimension_semantics<parallel>], iteration_bounds = array<i64: 1>, scalar_prefetch = 0 : i64, scratch_operands = 0 : i64, tpu.core_type = #tpu.core_type<tc>, window_params = [{transform_indices = @transform_0, window_bounds = array<i64: 8, 4>}, {pipeline_mode = #tpu.pipeline_mode<synchronous>, transform_indices = @transform_1, window_bounds = array<i64: 128, 32>}, {pipeline_mode = #tpu.pipeline_mode<synchronous>, transform_indices = @transform_2, window_bounds = array<i64: 1, 32>}, {pipeline_mode = #tpu.pipeline_mode<synchronous>, transform_indices = @transform_3, window_bounds = array<i64: 1, 32>}, {transform_indices = @transform_4, window_bounds = array<i64: 8, 128>}]} {
    %c0 = arith.constant 0 : index
    %c0_0 = arith.constant 0 : index
    %0 = vector.load %arg1[%c0, %c0_0] : memref<8x4xi32, #tpu.memory_space<vmem>>, vector<8x4xi32>
    %c0_1 = arith.constant 0 : index
    %c0_2 = arith.constant 0 : index
    %1 = vector.load %arg2[%c0_1, %c0_2] : memref<128x32xf32, #tpu.memory_space<vmem>>, vector<128x32xf32>
    %c0_3 = arith.constant 0 : index
    %c0_4 = arith.constant 0 : index
    %2 = vector.load %arg3[%c0_3, %c0_4] : memref<1x32xf32, #tpu.memory_space<vmem>>, vector<1x32xf32>
    %c0_5 = arith.constant 0 : index
    %c0_6 = arith.constant 0 : index
    %3 = vector.load %arg4[%c0_5, %c0_6] : memref<1x32xf32, #tpu.memory_space<vmem>>, vector<1x32xf32>
    %4 = tpu.iota {dimensions = array<i32: 1>} : vector<8x128xi32>
    %5 = vector.extract_strided_slice %0 {offsets = [0, 0], sizes = [8, 1], strides = [1, 1]} : vector<8x4xi32> to vector<8x1xi32>
    %6 = vector.broadcast %5 : vector<8x1xi32> to vector<8x128xi32>
    %7 = arith.cmpi eq, %4, %6 : vector<8x128xi32>
    %8 = arith.extui %7 : vector<8x128xi1> to vector<8x128xi32>
    %9 = arith.sitofp %8 : vector<8x128xi32> to vector<8x128xf32>
    %cst = arith.constant dense<0.000000e+00> : vector<8x32xf32>
    %10 = tpu.matmul %9, %1, %cst {dimension_numbers = #tpu.dot_dimension_numbers<[1], [0], [0], [1], [0, 0, 1, 1], [], []>} : vector<8x128xf32>, vector<128x32xf32>, vector<8x32xf32> -> vector<8x32xf32>
    %cst_7 = arith.constant dense<0.000000e+00> : vector<8xf32>
    %11 = vector.multi_reduction <add>, %10, %cst_7 [1] : vector<8x32xf32> to vector<8xf32>
    %12 = vector.shape_cast %11 : vector<8xf32> to vector<8x1xf32>
    %cst_8 = arith.constant 3.200000e+01 : f32
    %13 = vector.broadcast %cst_8 : f32 to vector<8x1xf32>
    %14 = arith.divf %12, %13 : vector<8x1xf32>
    %15 = vector.broadcast %14 : vector<8x1xf32> to vector<8x32xf32>
    %16 = arith.subf %10, %15 : vector<8x32xf32>
    %17 = arith.mulf %16, %16 : vector<8x32xf32>
    %cst_9 = arith.constant dense<0.000000e+00> : vector<8xf32>
    %18 = vector.multi_reduction <add>, %17, %cst_9 [1] : vector<8x32xf32> to vector<8xf32>
    %19 = vector.shape_cast %18 : vector<8xf32> to vector<8x1xf32>
    %cst_10 = arith.constant 3.200000e+01 : f32
    %20 = vector.broadcast %cst_10 : f32 to vector<8x1xf32>
    %21 = arith.divf %19, %20 : vector<8x1xf32>
    %cst_11 = arith.constant 9.99999974E-6 : f32
    %22 = vector.broadcast %cst_11 : f32 to vector<8x1xf32>
    %23 = arith.addf %21, %22 : vector<8x1xf32>
    %24 = math.rsqrt %23 : vector<8x1xf32>
    %25 = vector.broadcast %24 : vector<8x1xf32> to vector<8x32xf32>
    %26 = arith.mulf %16, %25 : vector<8x32xf32>
    %27 = vector.broadcast %2 : vector<1x32xf32> to vector<8x32xf32>
    %28 = arith.mulf %26, %27 : vector<8x32xf32>
    %29 = vector.broadcast %3 : vector<1x32xf32> to vector<8x32xf32>
    %30 = arith.addf %28, %29 : vector<8x32xf32>
    %c0_12 = arith.constant 0 : index
    %c0_13 = arith.constant 0 : index
    %31 = vector.load %arg5[%c0_12, %c0_13] : memref<8x128xf32, #tpu.memory_space<vmem>>, vector<8x32xf32>
    tpu.vector_store %arg5[%c0_12, %c0_13], %30 {strides = array<i32>} : memref<8x128xf32, #tpu.memory_space<vmem>>, vector<8x32xf32>,
    %32 = vector.extract_strided_slice %0 {offsets = [0, 1], sizes = [8, 1], strides = [1, 1]} : vector<8x4xi32> to vector<8x1xi32>
    %33 = vector.broadcast %32 : vector<8x1xi32> to vector<8x128xi32>
    %34 = arith.cmpi eq, %4, %33 : vector<8x128xi32>
    %35 = arith.extui %34 : vector<8x128xi1> to vector<8x128xi32>
    %36 = arith.sitofp %35 : vector<8x128xi32> to vector<8x128xf32>
    %cst_14 = arith.constant dense<0.000000e+00> : vector<8x32xf32>
    %37 = tpu.matmul %36, %1, %cst_14 {dimension_numbers = #tpu.dot_dimension_numbers<[1], [0], [0], [1], [0, 0, 1, 1], [], []>} : vector<8x128xf32>, vector<128x32xf32>, vector<8x32xf32> -> vector<8x32xf32>
    %cst_15 = arith.constant dense<0.000000e+00> : vector<8xf32>
    %38 = vector.multi_reduction <add>, %37, %cst_15 [1] : vector<8x32xf32> to vector<8xf32>
    %39 = vector.shape_cast %38 : vector<8xf32> to vector<8x1xf32>
    %cst_16 = arith.constant 3.200000e+01 : f32
    %40 = vector.broadcast %cst_16 : f32 to vector<8x1xf32>
    %41 = arith.divf %39, %40 : vector<8x1xf32>
    %42 = vector.broadcast %41 : vector<8x1xf32> to vector<8x32xf32>
    %43 = arith.subf %37, %42 : vector<8x32xf32>
    %44 = arith.mulf %43, %43 : vector<8x32xf32>
    %cst_17 = arith.constant dense<0.000000e+00> : vector<8xf32>
    %45 = vector.multi_reduction <add>, %44, %cst_17 [1] : vector<8x32xf32> to vector<8xf32>
    %46 = vector.shape_cast %45 : vector<8xf32> to vector<8x1xf32>
    %cst_18 = arith.constant 3.200000e+01 : f32
    %47 = vector.broadcast %cst_18 : f32 to vector<8x1xf32>
    %48 = arith.divf %46, %47 : vector<8x1xf32>
    %cst_19 = arith.constant 9.99999974E-6 : f32
    %49 = vector.broadcast %cst_19 : f32 to vector<8x1xf32>
    %50 = arith.addf %48, %49 : vector<8x1xf32>
    %51 = math.rsqrt %50 : vector<8x1xf32>
    %52 = vector.broadcast %51 : vector<8x1xf32> to vector<8x32xf32>
    %53 = arith.mulf %43, %52 : vector<8x32xf32>
    %54 = vector.broadcast %2 : vector<1x32xf32> to vector<8x32xf32>
    %55 = arith.mulf %53, %54 : vector<8x32xf32>
    %56 = vector.broadcast %3 : vector<1x32xf32> to vector<8x32xf32>
    %57 = arith.addf %55, %56 : vector<8x32xf32>
    %c0_20 = arith.constant 0 : index
    %c32 = arith.constant 32 : index
    %58 = vector.load %arg5[%c0_20, %c32] : memref<8x128xf32, #tpu.memory_space<vmem>>, vector<8x32xf32>
    tpu.vector_store %arg5[%c0_20, %c32], %57 {strides = array<i32>} : memref<8x128xf32, #tpu.memory_space<vmem>>, vector<8x32xf32>,
    %59 = vector.extract_strided_slice %0 {offsets = [0, 2], sizes = [8, 1], strides = [1, 1]} : vector<8x4xi32> to vector<8x1xi32>
    %60 = vector.broadcast %59 : vector<8x1xi32> to vector<8x128xi32>
    %61 = arith.cmpi eq, %4, %60 : vector<8x128xi32>
    %62 = arith.extui %61 : vector<8x128xi1> to vector<8x128xi32>
    %63 = arith.sitofp %62 : vector<8x128xi32> to vector<8x128xf32>
    %cst_21 = arith.constant dense<0.000000e+00> : vector<8x32xf32>
    %64 = tpu.matmul %63, %1, %cst_21 {dimension_numbers = #tpu.dot_dimension_numbers<[1], [0], [0], [1], [0, 0, 1, 1], [], []>} : vector<8x128xf32>, vector<128x32xf32>, vector<8x32xf32> -> vector<8x32xf32>
    %cst_22 = arith.constant dense<0.000000e+00> : vector<8xf32>
    %65 = vector.multi_reduction <add>, %64, %cst_22 [1] : vector<8x32xf32> to vector<8xf32>
    %66 = vector.shape_cast %65 : vector<8xf32> to vector<8x1xf32>
    %cst_23 = arith.constant 3.200000e+01 : f32
    %67 = vector.broadcast %cst_23 : f32 to vector<8x1xf32>
    %68 = arith.divf %66, %67 : vector<8x1xf32>
    %69 = vector.broadcast %68 : vector<8x1xf32> to vector<8x32xf32>
    %70 = arith.subf %64, %69 : vector<8x32xf32>
    %71 = arith.mulf %70, %70 : vector<8x32xf32>
    %cst_24 = arith.constant dense<0.000000e+00> : vector<8xf32>
    %72 = vector.multi_reduction <add>, %71, %cst_24 [1] : vector<8x32xf32> to vector<8xf32>
    %73 = vector.shape_cast %72 : vector<8xf32> to vector<8x1xf32>
    %cst_25 = arith.constant 3.200000e+01 : f32
    %74 = vector.broadcast %cst_25 : f32 to vector<8x1xf32>
    %75 = arith.divf %73, %74 : vector<8x1xf32>
    %cst_26 = arith.constant 9.99999974E-6 : f32
    %76 = vector.broadcast %cst_26 : f32 to vector<8x1xf32>
    %77 = arith.addf %75, %76 : vector<8x1xf32>
    %78 = math.rsqrt %77 : vector<8x1xf32>
    %79 = vector.broadcast %78 : vector<8x1xf32> to vector<8x32xf32>
    %80 = arith.mulf %70, %79 : vector<8x32xf32>
    %81 = vector.broadcast %2 : vector<1x32xf32> to vector<8x32xf32>
    %82 = arith.mulf %80, %81 : vector<8x32xf32>
    %83 = vector.broadcast %3 : vector<1x32xf32> to vector<8x32xf32>
    %84 = arith.addf %82, %83 : vector<8x32xf32>
    %c0_27 = arith.constant 0 : index
    %c64 = arith.constant 64 : index
    %85 = vector.load %arg5[%c0_27, %c64] : memref<8x128xf32, #tpu.memory_space<vmem>>, vector<8x32xf32>
    tpu.vector_store %arg5[%c0_27, %c64], %84 {strides = array<i32>} : memref<8x128xf32, #tpu.memory_space<vmem>>, vector<8x32xf32>,
    %86 = vector.extract_strided_slice %0 {offsets = [0, 3], sizes = [8, 1], strides = [1, 1]} : vector<8x4xi32> to vector<8x1xi32>
    %87 = vector.broadcast %86 : vector<8x1xi32> to vector<8x128xi32>
    %88 = arith.cmpi eq, %4, %87 : vector<8x128xi32>
    %89 = arith.extui %88 : vector<8x128xi1> to vector<8x128xi32>
    %90 = arith.sitofp %89 : vector<8x128xi32> to vector<8x128xf32>
    %cst_28 = arith.constant dense<0.000000e+00> : vector<8x32xf32>
    %91 = tpu.matmul %90, %1, %cst_28 {dimension_numbers = #tpu.dot_dimension_numbers<[1], [0], [0], [1], [0, 0, 1, 1], [], []>} : vector<8x128xf32>, vector<128x32xf32>, vector<8x32xf32> -> vector<8x32xf32>
    %cst_29 = arith.constant dense<0.000000e+00> : vector<8xf32>
    %92 = vector.multi_reduction <add>, %91, %cst_29 [1] : vector<8x32xf32> to vector<8xf32>
    %93 = vector.shape_cast %92 : vector<8xf32> to vector<8x1xf32>
    %cst_30 = arith.constant 3.200000e+01 : f32
    %94 = vector.broadcast %cst_30 : f32 to vector<8x1xf32>
    %95 = arith.divf %93, %94 : vector<8x1xf32>
    %96 = vector.broadcast %95 : vector<8x1xf32> to vector<8x32xf32>
    %97 = arith.subf %91, %96 : vector<8x32xf32>
    %98 = arith.mulf %97, %97 : vector<8x32xf32>
    %cst_31 = arith.constant dense<0.000000e+00> : vector<8xf32>
    %99 = vector.multi_reduction <add>, %98, %cst_31 [1] : vector<8x32xf32> to vector<8xf32>
    %100 = vector.shape_cast %99 : vector<8xf32> to vector<8x1xf32>
    %cst_32 = arith.constant 3.200000e+01 : f32
    %101 = vector.broadcast %cst_32 : f32 to vector<8x1xf32>
    %102 = arith.divf %100, %101 : vector<8x1xf32>
    %cst_33 = arith.constant 9.99999974E-6 : f32
    %103 = vector.broadcast %cst_33 : f32 to vector<8x1xf32>
    %104 = arith.addf %102, %103 : vector<8x1xf32>
    %105 = math.rsqrt %104 : vector<8x1xf32>
    %106 = vector.broadcast %105 : vector<8x1xf32> to vector<8x32xf32>
    %107 = arith.mulf %97, %106 : vector<8x32xf32>
    %108 = vector.broadcast %2 : vector<1x32xf32> to vector<8x32xf32>
    %109 = arith.mulf %107, %108 : vector<8x32xf32>
    %110 = vector.broadcast %3 : vector<1x32xf32> to vector<8x32xf32>
    %111 = arith.addf %109, %110 : vector<8x32xf32>
    %c0_34 = arith.constant 0 : index
    %c96 = arith.constant 96 : index
    %112 = vector.load %arg5[%c0_34, %c96] : memref<8x128xf32, #tpu.memory_space<vmem>>, vector<8x32xf32>
    tpu.vector_store %arg5[%c0_34, %c96], %111 {strides = array<i32>} : memref<8x128xf32, #tpu.memory_space<vmem>>, vector<8x32xf32>,
    return
  }
  func.func @transform_0(%arg0: i32) -> (i32, i32) {
    %c0_i32 = arith.constant 0 : i32
    %c0_i32_0 = arith.constant 0 : i32
    return %arg0, %c0_i32 : i32, i32
  }
  func.func @transform_1(%arg0: i32) -> (i32, i32) {
    %c0_i32 = arith.constant 0 : i32
    %c0_i32_0 = arith.constant 0 : i32
    %c0_i32_1 = arith.constant 0 : i32
    return %c0_i32, %c0_i32_0 : i32, i32
  }
  func.func @transform_2(%arg0: i32) -> (i32, i32) {
    %c0_i32 = arith.constant 0 : i32
    %c0_i32_0 = arith.constant 0 : i32
    %c0_i32_1 = arith.constant 0 : i32
    return %c0_i32, %c0_i32_0 : i32, i32
  }
  func.func @transform_3(%arg0: i32) -> (i32, i32) {
    %c0_i32 = arith.constant 0 : i32
    %c0_i32_0 = arith.constant 0 : i32
    %c0_i32_1 = arith.constant 0 : i32
    return %c0_i32, %c0_i32_0 : i32, i32
  }
  func.func @transform_4(%arg0: i32) -> (i32, i32) {
    %c0_i32 = arith.constant 0 : i32
    %c0_i32_0 = arith.constant 0 : i32
    return %arg0, %c0_i32 : i32, i32
  }
}

</mosaic_0001>

<bundles_post_ra>
// kernel: tpu_custom_call.1
= control target key start
LH: loop header
LB: loop body
LE: loop exit
PB: predicated region body
PF: predicated region fallthrough
CT: control target
= control target key end

     0   :  { %v813_v2 = vmov 0   ;;  %v814_v3 = vmov 2   ;;  %v815_v8 = vmov 0.0|0.0   ;;  %v816_v12 = vmov 1   ;;  %s982_s0 = inlined_call_operand.vmem [shape: s32[8,4], index: 0, kind: input, shape index: {}]   ;;  %s983_s1 = inlined_call_operand.vmem [shape: f32[128,32], index: 1, kind: input, shape index: {}]   ;;  %s984_s2 = inlined_call_operand.vmem [shape: f32[1,32], index: 2, kind: input, shape index: {}]   ;;  %s985_s3 = inlined_call_operand.vmem [shape: f32[1,32], index: 3, kind: input, shape index: {}]   ;;  %s986_s4 = inlined_call_operand.hbm [shape: f32[8,128], index: 4, kind: output, shape index: {}]  }
   0x1   :  { %v18_v0 = vld [vmem:[%s982_s0] sm:$0xff]  ;;  %776 = vset.pattern.permute.xlu0 %v813_v2  ;;  %778 = vset.pattern.permute.xlu1 %v814_v3  ;;  %v20_v4 = vld [vmem:[%s983_s1 + $0x8] sm:$0xff]  ;;  %v21_v5 = vld [vmem:[%s983_s1 + $0x10] sm:$0xff]  ;;  %v817_v13 = vmov 3  }
   0x2   :  { %v19_v1 = vld [vmem:[%s983_s1] sm:$0xff]  ;;  %v22_v6 = vld [vmem:[%s983_s1 + $0x18] sm:$0xff]  ;;  %40 = vperm.xlu0 %776, %v18_v0   ;;  %243 = vperm.xlu1 %778, %v18_v0   ;;  %v24_v11 = vld [vmem:[%s983_s1 + $0x28] sm:$0xff] }
   0x3   :  { %v865_v7 = vpack.c.bf16 %v20_v4, %v19_v1  ;;  %668 = vmatprep.subr.bf16.mxu0 %v815_v8  ;;  %692 = vmatprep.subr.bf16.mxu1 %v815_v8  ;;  %v870_v9 = vpack.c.bf16 %v22_v6, %v21_v5  ;;  %v23_v10 = vld [vmem:[%s983_s1 + $0x20] sm:$0xff] }
   0x5   :  { %670 = vmatpush3.bf16.msra.mxu0 %v865_v7  ;;  %694 = vmatpush3.bf16.msra.mxu1 %v865_v7 }
   0x6   :  { %671 = vmatprep.subr.bf16.mxu0 %v815_v8  ;;  %695 = vmatprep.subr.bf16.mxu1 %v815_v8 }
   0x7   :  { %777 = vset.pattern.permute.xlu0 %v816_v12  ;;  %779 = vset.pattern.permute.xlu1 %v817_v13 }
   0x8   :  { %9 = vsyncpa [#allocation3], 0  ;;  %146 = vperm.xlu0 %777, %v18_v0   ;;  %340 = vperm.xlu1 %779, %v18_v0   ;;  %v882_v14 = vpack.c.bf16 %v24_v11, %v23_v10  ;;  %v25_v15 = vld [vmem:[%s983_s1 + $0x30] sm:$0xff]  ;;  %v26_v16 = vld [vmem:[%s983_s1 + $0x38] sm:$0xff]  ;;  %vm818_vm0 = vmmov 0   ;;  %v819_v17 = vmov 0.0   ;;  %v37_v31 = vlaneseq }
   0x9   :  { %673 = vmatpush3.bf16.msra.mxu0 %v870_v9  ;;  %697 = vmatpush3.bf16.msra.mxu1 %v870_v9  ;;  %v678_v18 = vpack.c.bf16 %v26_v16, %v25_v15  ;;  %v27_v19 = vld [vmem:[%s983_s1 + $0x40] sm:$0xff]  ;;  %v28_v20 = vld [vmem:[%s983_s1 + $0x48] sm:$0xff]  ;;  %v29_v22 = vld [vmem:[%s983_s1 + $0x50] sm:$0xff]  ;;  %v820_v34 = vmov 1.0   ;;  %vm115_vm5 = vcmask 261120   ;;  %s821_s0 = smov 32  }
   0xa   :  { %674 = vmatprep.subr.bf16.mxu0 %v815_v8  ;;  %698 = vmatprep.subr.bf16.mxu1 %v815_v8  ;;  %v681_v21 = vpack.c.bf16 %v28_v20, %v27_v19  ;;  %v30_v23 = vld [vmem:[%s983_s1 + $0x58] sm:$0xff]  ;;  %v31_v25 = vld [vmem:[%s983_s1 + $0x60] sm:$0xff]  ;;  %v32_v26 = vld [vmem:[%s983_s1 + $0x68] sm:$0xff]  ;;  %v38_v32 = vand.u32 127, %v37_v31  ;;  %vm240_vm6 = vcmask 523520   ;;  %vm337_vm7 = vcmask 785920  }
   0xb   :  { %560 = vmatprep.mubr.msk.f32.mxu0 %vm818_vm0, %v819_v17  ;;  %595 = vmatprep.mubr.msk.f32.mxu1 %vm818_vm0, %v819_v17  ;;  %v684_v24 = vpack.c.bf16 %v30_v23, %v29_v22  ;;  %v687_v27 = vpack.c.bf16 %v32_v26, %v31_v25  ;;  %v33_v28 = vld [vmem:[%s983_s1 + $0x70] sm:$0xff]  ;;  %v34_v29 = vld [vmem:[%s983_s1 + $0x78] sm:$0xff]  ;;  %v452_v10 = vld [vmem:[%s984_s2] ss:$0 sm:$0xff]  ;;  %s822_s2 = smov 64   ;;  %s824_s25 = smov [#allocation2]  }
   0xc   :  { %780 = vset.pattern.permute.xlu0 %v817_v13  ;;  %v690_v30 = vpack.c.bf16 %v34_v29, %v33_v28  ;;  %v453_v12 = vld [vmem:[%s985_s3] ss:$0 sm:$0xff]  ;;  %s823_s3 = smov 96   ;;  %s442_s26 = sshll.u32 %s824_s25, 4  ;;  %vm434_vm8 = vcmask 1048320   ;;  %s443_s26 = int_to_ptr.vmem [resolvable:$true] %s442_s26 }
   0xd   :  { %676 = vmatpush3.bf16.msra.mxu0 %v882_v14  ;;  %700 = vmatpush3.bf16.msra.mxu1 %v882_v14  ;;  %s789_s27 = scalar_lea.vmem %s443_s26, 128  ;;  %p794_p1 = scmp.lt.s32.totalorder %s443_s26, %s443_s26 }
   0xe   :  { %677 = vmatprep.subr.bf16.mxu0 %v815_v8  ;;  %701 = vmatprep.subr.bf16.mxu1 %v815_v8  ;;  %p790_p0 = scmp.ne.s32.totalorder %s443_s26, %s789_s27  ;;  %p795_p2 = scmp.lt.s32.totalorder %s789_s27, %s789_s27 }
  0x10   :  { %p796_p3 = por %p795_p2, %p794_p1 }
  0x11   :  { %679 = vmatpush3.bf16.msra.mxu0 %v678_v18  ;;  %703 = vmatpush3.bf16.msra.mxu1 %v678_v18 }
  0x12   :  { %680 = vmatprep.subr.bf16.mxu0 %v815_v8  ;;  %704 = vmatprep.subr.bf16.mxu1 %v815_v8  ;;  %p797_p4 = pnand %p796_p3, %p790_p0 }
  0x15   :  { %682 = vmatpush3.bf16.msra.mxu0 %v681_v21  ;;  %706 = vmatpush3.bf16.msra.mxu1 %v681_v21 }
  0x16   :  { %683 = vmatprep.subr.bf16.mxu0 %v815_v8  ;;  %707 = vmatprep.subr.bf16.mxu1 %v815_v8 }
  0x19   :  { %685 = vmatpush3.bf16.msra.mxu0 %v684_v24  ;;  %709 = vmatpush3.bf16.msra.mxu1 %v684_v24 }
  0x1a   :  { %686 = vmatprep.subr.bf16.mxu0 %v815_v8  ;;  %710 = vmatprep.subr.bf16.mxu1 %v815_v8 }
  0x1d   :  { %688 = vmatpush3.bf16.msra.mxu0 %v687_v27  ;;  %712 = vmatpush3.bf16.msra.mxu1 %v687_v27 }
  0x1e   :  { %689 = vmatprep.subr.bf16.mxu0 %v815_v8  ;;  %713 = vmatprep.subr.bf16.mxu1 %v815_v8 }
  0x21   :  { %691 = vmatpush3.bf16.msra.mxu0 %v690_v30  ;;  %715 = vmatpush3.bf16.msra.mxu1 %v690_v30 }
  0x22   :  { %716 = vmatprep.subr.bf16.mxu0 %v815_v8  ;;  %740 = vmatprep.subr.bf16.mxu1 %v815_v8 }
  0x81   :  { %v41_v33 = vpop.permute.xlu0 %40  ;;  %v244_v36 = vpop.permute.xlu1 %243 }
  0x82   :  { %vm42_vm1 = vcmp.eq.s32.totalorder %v38_v32, %v41_v33  ;;  %vm245_vm3 = vcmp.eq.s32.totalorder %v38_v32, %v244_v36 }
  0x83   :  { %561 = vmatmul.mubr.msk.f32.vlgmr.msra.gmra.mrb[0].mxu0 %vm42_vm1, %v820_v34 }
  0x84   :  { %718 = vmatpush3.bf16.msra.mxu0 %v865_v7  ;;  %630 = vmatprep.mubr.msk.f32.mxu0 %vm818_vm0, %v819_v17 }
  0x85   :  { %719 = vmatprep.subr.bf16.mxu0 %v815_v8 }
  0x87   :  { %v147_v35 = vpop.permute.xlu0 %146  ;;  %v341_v37 = vpop.permute.xlu1 %340 }
  0x88   :  { %vm148_vm2 = vcmp.eq.s32.totalorder %v38_v32, %v147_v35  ;;  %721 = vmatpush3.bf16.msra.mxu0 %v870_v9  ;;  %vm342_vm4 = vcmp.eq.s32.totalorder %v38_v32, %v341_v37 }
  0x89   :  { %596 = vmatmul.mubr.msk.f32.vlgmr.msra.gmra.mrb[0].mxu1 %vm148_vm2, %v820_v34  ;;  %722 = vmatprep.subr.bf16.mxu0 %v815_v8 }
  0x8a   :  { %742 = vmatpush3.bf16.msra.mxu1 %v865_v7  ;;  %665 = vmatprep.mubr.msk.f32.mxu1 %vm818_vm0, %v819_v17 }
  0x8b   :  { %743 = vmatprep.subr.bf16.mxu1 %v815_v8 }
  0x8c   :  { %724 = vmatpush3.bf16.msra.mxu0 %v882_v14 }
  0x8d   :  { %725 = vmatprep.subr.bf16.mxu0 %v815_v8 }
  0x8e   :  { %745 = vmatpush3.bf16.msra.mxu1 %v870_v9 }
  0x8f   :  { %746 = vmatprep.subr.bf16.mxu1 %v815_v8 }
  0x90   :  { %727 = vmatpush3.bf16.msra.mxu0 %v678_v18 }
  0x91   :  { %728 = vmatprep.subr.bf16.mxu0 %v815_v8 }
  0x92   :  { %748 = vmatpush3.bf16.msra.mxu1 %v882_v14 }
  0x93   :  { %749 = vmatprep.subr.bf16.mxu1 %v815_v8 }
  0x94   :  { %730 = vmatpush3.bf16.msra.mxu0 %v681_v21 }
  0x95   :  { %731 = vmatprep.subr.bf16.mxu0 %v815_v8 }
  0x96   :  { %751 = vmatpush3.bf16.msra.mxu1 %v678_v18 }
  0x97   :  { %752 = vmatprep.subr.bf16.mxu1 %v815_v8 }
  0x98   :  { %733 = vmatpush3.bf16.msra.mxu0 %v684_v24 }
  0x99   :  { %734 = vmatprep.subr.bf16.mxu0 %v815_v8 }
  0x9a   :  { %754 = vmatpush3.bf16.msra.mxu1 %v681_v21 }
  0x9b   :  { %755 = vmatprep.subr.bf16.mxu1 %v815_v8 }
  0x9c   :  { %736 = vmatpush3.bf16.msra.mxu0 %v687_v27 }
  0x9d   :  { %737 = vmatprep.subr.bf16.mxu0 %v815_v8 }
  0x9e   :  { %757 = vmatpush3.bf16.msra.mxu1 %v684_v24 }
  0x9f   :  { %758 = vmatprep.subr.bf16.mxu1 %v815_v8 }
  0xa0   :  { %739 = vmatpush3.bf16.msra.mxu0 %v690_v30 }
  0xa2   :  { %760 = vmatpush3.bf16.msra.mxu1 %v687_v27 }
  0xa3   :  { %761 = vmatprep.subr.bf16.mxu1 %v815_v8  ;;  %631 = vmatmul.mubr.msk.f32.vlgmr.msra.gmra.mrb[2].mxu0 %vm245_vm3, %v820_v34 }
  0xa6   :  { %763 = vmatpush3.bf16.msra.mxu1 %v690_v30 }
  0xa9   :  { %666 = vmatmul.mubr.msk.f32.vlgmr.msra.gmra.mrb[2].mxu1 %vm342_vm4, %v820_v34 }
 0x156   :  { %v111_v38 = vpop.f32.mrb[0].mxu0 }
 0x157   :  { %v562_v39 = vpop.f32.mrb[1].mxu0  ;;  %v116_v43 = vsel %vm115_vm5, %v111_v38, 0.0 }
 0x15c   :  { %v217_v40 = vpop.f32.mrb[0].mxu1 }
 0x15d   :  { %v597_v41 = vpop.f32.mrb[1].mxu1  ;;  %v221_v42 = vsel %vm115_vm5, %v217_v40, 0.0 }
 0x15e   :  { %222 = vadd.xlane.f32.xlu1 %v221_v42 }
 0x162   :  { %117 = vadd.xlane.f32.xlu1 %v116_v43 }
 0x176   :  { %v314_v44 = vpop.f32.mrb[2].mxu0 }
 0x177   :  { %v632_v45 = vpop.f32.mrb[3].mxu0  ;;  %v318_v46 = vsel %vm115_vm5, %v314_v44, 0.0 }
 0x178   :  { %319 = vadd.xlane.f32.xlu0 %v318_v46 }
 0x17c   :  { %v411_v47 = vpop.f32.mrb[2].mxu1 }
 0x17d   :  { %v667_v48 = vpop.f32.mrb[3].mxu1  ;;  %v415_v49 = vsel %vm115_vm5, %v411_v47, 0.0 }
 0x17e   :  { %416 = vadd.xlane.f32.xlu0 %v415_v49 }
 0x1eb   :  { %v223_v50 = vpop.xlane.xlu1 %222 }
 0x1ec   :  { %v224_v51 = vmul.f32 0.03125, %v223_v50 }
 0x1ee   :  { %v225_v52 = vsub.f32 %v217_v40, %v224_v51 }
 0x1ef   :  { %v118_v55 = vpop.xlane.xlu1 %117 }
 0x1f0   :  { %v226_v53 = vmul.f32 %v225_v52, %v225_v52  ;;  %v120_v56 = vmul.f32 0.03125, %v118_v55 }
 0x1f2   :  { %v227_v54 = vsel %vm115_vm5, %v226_v53, 0.0  ;;  %v121_v59 = vsub.f32 %v111_v38, %v120_v56 }
 0x1f3   :  { %228 = vadd.xlane.f32.xlu0 %v227_v54 }
 0x1f4   :  { %v122_v1 = vmul.f32 %v121_v59, %v121_v59 }
 0x1f6   :  { %v123_v4 = vsel %vm115_vm5, %v122_v1, 0.0 }
 0x205   :  { %v320_v57 = vpop.xlane.xlu0 %319 }
 0x206   :  { %v321_v58 = vmul.f32 0.03125, %v320_v57 }
 0x208   :  { %v322_v60 = vsub.f32 %v314_v44, %v321_v58 }
 0x20a   :  { %v323_v62 = vmul.f32 %v322_v60, %v322_v60 }
 0x20b   :  { %v417_v61 = vpop.xlane.xlu0 %416 }
 0x20c   :  { %v418_v63 = vmul.f32 0.03125, %v417_v61  ;;  %v324_v0 = vsel %vm115_vm5, %v323_v62, 0.0 }
 0x20d   :  { %325 = vadd.xlane.f32.xlu1 %v324_v0 }
 0x20e   :  { %v419_v2 = vsub.f32 %v411_v47, %v418_v63 }
 0x210   :  { %v420_v3 = vmul.f32 %v419_v2, %v419_v2 }
 0x211   :  { %124 = vadd.xlane.f32.xlu1 %v123_v4 }
 0x212   :  { %v421_v5 = vsel %vm115_vm5, %v420_v3, 0.0 }
 0x213   :  { %422 = vadd.xlane.f32.xlu0 %v421_v5 }
 0x280   :  { %v229_v6 = vpop.xlane.xlu0 %228 }
 0x281   :  { %v230_v7 = vmul.f32 0.03125, %v229_v6 }
 0x283   :  { %v231_v8 = vadd.f32 1e-05, %v230_v7 }
 0x285   :  { %781 = vrsqrt.f32 %v231_v8 }
 0x28f   :  { %v782_v9 = vpop.eup %781 }
 0x290   :  { %v233_v11 = vmul.f32 %v782_v9, %v225_v52 }
 0x292   :  { %v234_v13 = vmul.f32 %v452_v10, %v233_v11 }
 0x294   :  { %v235_v14 = vadd.f32 %v453_v12, %v234_v13 }
 0x296   :  { %237 = vrot.lane.b32.xlu0 %v235_v14, %s821_s0 }
 0x29a   :  { %v326_v15 = vpop.xlane.xlu1 %325 }
 0x29b   :  { %v327_v16 = vmul.f32 0.03125, %v326_v15 }
 0x29d   :  { %v328_v17 = vadd.f32 1e-05, %v327_v16 }
 0x29e   :  { %v125_v18 = vpop.xlane.xlu1 %124 }
 0x29f   :  { %783 = vrsqrt.f32 %v328_v17  ;;  %v126_v19 = vmul.f32 0.03125, %v125_v18 }
 0x2a0   :  { %v423_v20 = vpop.xlane.xlu0 %422 }
 0x2a1   :  { %v424_v21 = vmul.f32 0.03125, %v423_v20  ;;  %v127_v22 = vadd.f32 1e-05, %v126_v19 }
 0x2a3   :  { %v425_v23 = vadd.f32 1e-05, %v424_v21  ;;  %785 = vrsqrt.f32 %v127_v22 }
 0x2a5   :  { %787 = vrsqrt.f32 %v425_v23 }
 0x2a9   :  { %v784_v24 = vpop.eup %783 }
 0x2aa   :  { %v330_v25 = vmul.f32 %v784_v24, %v322_v60 }
 0x2ac   :  { %v331_v26 = vmul.f32 %v452_v10, %v330_v25 }
 0x2ad   :  { %v786_v27 = vpop.eup %785 }
 0x2ae   :  { %v332_v29 = vadd.f32 %v453_v12, %v331_v26  ;;  %v129_v30 = vmul.f32 %v786_v27, %v121_v59 }
 0x2af   :  { %v788_v28 = vpop.eup %787 }
 0x2b0   :  { %v427_v31 = vmul.f32 %v788_v28, %v419_v2  ;;  %334 = vrot.lane.b32.xlu1 %v332_v29, %s822_s2  ;;  %v136_v32 = vmul.f32 %v452_v10, %v129_v30 }
 0x2b2   :  { %v428_v33 = vmul.f32 %v452_v10, %v427_v31  ;;  %v143_v34 = vadd.f32 %v453_v12, %v136_v32 }
 0x2b4   :  { %v429_v35 = vadd.f32 %v453_v12, %v428_v33  ;;  %144 = vst.msk [vmem:[#allocation2] sm:$0xff] %vm115_vm5, %v143_v34 }
 0x2b6   :  { %431 = vrot.lane.b32.xlu1 %v429_v35, %s823_s3 }
 0x308   :  { %v238_v36 = vpop.permute.xlu0 %237 }
 0x309   :  { %241 = vst.msk [vmem:[#allocation2] sm:$0xff] %vm240_vm6, %v238_v36 }
 0x322   :  { %v335_v37 = vpop.permute.xlu1 %334 }
 0x323   :  { %338 = vst.msk [vmem:[#allocation2] sm:$0xff] %vm337_vm7, %v335_v37 }
 0x328   :  { %v432_v38 = vpop.permute.xlu1 %431 }
 0x329   :  { %435 = vst.msk [vmem:[#allocation2] sm:$0xff] %vm434_vm8, %v432_v38 }
 0x32a   :  { %800 = shalt.err (!%p797_p4)
}
 0x32b   :  { %s801_s30 = scalar_lea.hbm %s986_s4, 128 }
 0x32c   :  { %p802_p5 = scmp.ne.s32.totalorder %s986_s4, %s801_s30  ;;  %p805_p6 = scmp.lt.u32.totalorder %s801_s30, %s986_s4 }
 0x32e   :  { %p807_p7 = pnand %p805_p6, %p802_p5 }
 0x330   :  { %810 = shalt.err (!%p807_p7)
}
 0x331   :  { %445 = dma.vmem_to_hbm [thread:$0]  %s443_s26, 128, %s986_s4, [#allocation3]  }
 0x332   :  { %811 = dma.done.wait [#allocation3], 128  }
 0x333   :  { %812 = vsyncadd [#allocation3], 4294967168 }
 0x334   :  { %449 = vsyncpa [#allocation3], 1 }

</bundles_post_ra>
